<compile_context>
chip_gen: v6e
topology: v6e:2x2x1
jax: 0.10.0
libtpu: 0.0.40
codegen_flags: <defaults>
</compile_context>

<pallas_src>
import math
from functools import partial

import jax
import jax.numpy as jnp
from jax.experimental import pallas as pl
from jax.experimental.pallas import tpu as pltpu


def _round_up(v, m):
    return (v + m - 1) // m * m


def _swiglu_kernel(x_ref, w12_ref, b12_ref, w3_ref, b3_ref, o_ref, *, h_p):
    # x_ref:   (TILE_M, d_in_p)   compute dtype (bf16), streamed per tile
    # w12_ref: (d_in_p, 2*h_p)    compute dtype, resident
    # b12_ref: (1, 2*h_p)         f32, resident
    # w3_ref:  (h_p, d_out_p)     compute dtype, resident
    # b3_ref:  (1, d_out_p)       f32, resident
    x = x_ref[...]

    # Fused first projection: [x1 | x2] in one MXU pass, f32 accumulator,
    # bias added once in the epilogue.
    h = jnp.dot(x, w12_ref[...], preferred_element_type=jnp.float32) + b12_ref[...]
    x1 = h[:, :h_p]
    x2 = h[:, h_p:]

    # SiLU(x1) * x2 in f32 (VPU + EUP). ffn_ln is Identity for subln=False.
    # TODO(synk): add the LayerNorm path here if subln=True is ever needed.
    hidden = (x1 * jax.nn.sigmoid(x1)) * x2

    # Output projection: bf16 operands, f32 accumulate. Dropout(p=0) = identity.
    out = jnp.dot(hidden.astype(w3_ref.dtype), w3_ref[...],
                  preferred_element_type=jnp.float32) + b3_ref[...]
    o_ref[...] = out.astype(o_ref.dtype)


def swiglu(x, w1, b1, w2, b2, w3, b3, *, tile_m=256, compute_dtype=jnp.bfloat16):
    """x: (..., in_features). Weights pre-transposed: w1/w2 (in, hidden), w3 (hidden, out)."""
    orig_shape = x.shape
    d_in = orig_shape[-1]
    d_hidden = w1.shape[1]
    d_out = w3.shape[1]
    out_dtype = x.dtype

    tokens = math.prod(orig_shape[:-1]) if len(orig_shape) > 1 else 1

    # Pad every lane dim to a multiple of 128 (MXU width / lane-dense stores).
    d_in_p = _round_up(d_in, 128)
    h_p = _round_up(d_hidden, 128)
    d_out_p = _round_up(d_out, 128)

    # Token tiling (sublane aligned); pad the token axis up to a tile multiple.
    tile_m = min(tile_m, _round_up(max(tokens, 1), 16))
    tokens_p = _round_up(tokens, tile_m)
    grid_m = tokens_p // tile_m

    f32 = jnp.float32
    # Fused + zero-padded weights (zero padding keeps the math exact:
    # padded x1/x2 columns are 0 -> SiLU(0)*0 = 0 -> no contribution to W3).
    w12 = jnp.zeros((d_in_p, 2 * h_p), f32)
    w12 = w12.at[:d_in, :d_hidden].set(w1.astype(f32))
    w12 = w12.at[:d_in, h_p:h_p + d_hidden].set(w2.astype(f32))
    w12 = w12.astype(compute_dtype)

    b12 = jnp.zeros((1, 2 * h_p), f32)
    b12 = b12.at[0, :d_hidden].set(b1.astype(f32))
    b12 = b12.at[0, h_p:h_p + d_hidden].set(b2.astype(f32))

    w3p = jnp.zeros((h_p, d_out_p), f32).at[:d_hidden, :d_out].set(w3.astype(f32))
    w3p = w3p.astype(compute_dtype)
    b3p = jnp.zeros((1, d_out_p), f32).at[0, :d_out].set(b3.astype(f32))

    x2d = x.reshape(tokens, d_in).astype(compute_dtype)
    xp = jnp.zeros((tokens_p, d_in_p), compute_dtype).at[:tokens, :d_in].set(x2d)

    kernel = partial(_swiglu_kernel, h_p=h_p)

    # Cost hint for the XLA scheduler.
    out_itemsize = x.dtype.itemsize
    flops = 2 * tokens_p * d_in_p * (2 * h_p) + 2 * tokens_p * h_p * d_out_p
    bytes_accessed = (xp.size * xp.dtype.itemsize
                      + w12.size * w12.dtype.itemsize + b12.size * 4
                      + w3p.size * w3p.dtype.itemsize + b3p.size * 4
                      + tokens_p * d_out_p * out_itemsize)
    cost = pl.CostEstimate(flops=flops, transcendentals=tokens_p * h_p,
                           bytes_accessed=bytes_accessed)

    # VMEM budget: resident weights + double-buffered x/out tiles + f32 temps.
    cb = xp.dtype.itemsize
    resident = (w12.size + w3p.size) * cb + (b12.size + b3p.size) * 4
    streamed = 2 * tile_m * (d_in_p * cb + d_out_p * out_itemsize)
    temps = tile_m * (2 * h_p) * 4 + tile_m * h_p * cb + tile_m * d_out_p * 4
    vmem_limit = int(min(max(2 * (resident + streamed + temps), 32 * 2 ** 20),
                         48 * 2 ** 20))

    out_pad = pl.pallas_call(
        kernel,
        out_shape=jax.ShapeDtypeStruct((tokens_p, d_out_p), out_dtype),
        grid_spec=pltpu.PrefetchScalarGridSpec(
            num_scalar_prefetch=0,
            grid=(grid_m,),
            in_specs=[
                pl.BlockSpec((tile_m, d_in_p), lambda i: (i, 0)),    # x (streamed)
                pl.BlockSpec((d_in_p, 2 * h_p), lambda i: (0, 0)),   # W1|W2 (resident)
                pl.BlockSpec((1, 2 * h_p), lambda i: (0, 0)),        # b1|b2 (resident)
                pl.BlockSpec((h_p, d_out_p), lambda i: (0, 0)),      # W3 (resident)
                pl.BlockSpec((1, d_out_p), lambda i: (0, 0)),        # b3 (resident)
            ],
            out_specs=pl.BlockSpec((tile_m, d_out_p), lambda i: (i, 0)),
        ),
        compiler_params=pltpu.CompilerParams(
            dimension_semantics=("parallel",),
            vmem_limit_bytes=vmem_limit),
        cost_estimate=cost,
    )(xp, w12, b12, w3p, b3p)

    out = out_pad[:tokens, :d_out]
    return out.reshape(*orig_shape[:-1], d_out)


def _reference(x, w1, b1, w2, b2, w3, b3):
    x1 = x @ w1 + b1
    x2 = x @ w2 + b2
    hidden = jax.nn.silu(x1) * x2
    return hidden @ w3 + b3


if __name__ == "__main__":
    # Small shapes consistent with the module: tokens over (batch, seq),
    # in_features=32, hidden_features=64, out_features=32.
    batch, seq = 2, 8
    d_in, d_hidden, d_out = 32, 64, 32

    key = jax.random.PRNGKey(0)
    k = jax.random.split(key, 7)
    x = jax.random.normal(k[0], (batch, seq, d_in), dtype=jnp.float32)
    # Deterministic parameter init (synthetic; mimics Linear-scale init).
    w1 = jax.random.normal(k[1], (d_in, d_hidden), dtype=jnp.float32) * (1.0 / d_in ** 0.5)
    b1 = jax.random.normal(k[2], (d_hidden,), dtype=jnp.float32) * 0.01
    w2 = jax.random.normal(k[3], (d_in, d_hidden), dtype=jnp.float32) * (1.0 / d_in ** 0.5)
    b2 = jax.random.normal(k[4], (d_hidden,), dtype=jnp.float32) * 0.01
    w3 = jax.random.normal(k[5], (d_hidden, d_out), dtype=jnp.float32) * (1.0 / d_hidden ** 0.5)
    b3 = jax.random.normal(k[6], (d_out,), dtype=jnp.float32) * 0.01

    out = swiglu(x, w1, b1, w2, b2, w3, b3)
    out = jax.block_until_ready(out)

    ref = _reference(x, w1, b1, w2, b2, w3, b3)
    assert out.shape == (batch, seq, d_out)
    # bf16 MXU operands + f32 accumulation -> compare at bf16-level tolerance.
    assert jnp.allclose(out.astype(jnp.float32), ref, atol=5e-2, rtol=5e-2), \
        "mismatch vs reference"
    print("KERNEL_OK")
</pallas_src>

<mosaic_0001>
module attributes {stable_mosaic.version = 11 : i64} {
  func.func @_swiglu_kernel(%arg0: i32, %arg1: memref<16x128xbf16, #tpu.memory_space<vmem>>, %arg2: memref<128x256xbf16, #tpu.memory_space<vmem>>, %arg3: memref<1x256xf32, #tpu.memory_space<vmem>>, %arg4: memref<128x128xbf16, #tpu.memory_space<vmem>>, %arg5: memref<1x128xf32, #tpu.memory_space<vmem>>, %arg6: memref<16x128xf32, #tpu.memory_space<vmem>>) attributes {dimension_semantics = [#tpu.dimension_semantics<parallel>], iteration_bounds = array<i64: 1>, scalar_prefetch = 0 : i64, scratch_operands = 0 : i64, tpu.core_type = #tpu.core_type<tc>, window_params = [{transform_indices = @transform_0, window_bounds = array<i64: 16, 128>}, {pipeline_mode = #tpu.pipeline_mode<synchronous>, transform_indices = @transform_1, window_bounds = array<i64: 128, 256>}, {pipeline_mode = #tpu.pipeline_mode<synchronous>, transform_indices = @transform_2, window_bounds = array<i64: 1, 256>}, {pipeline_mode = #tpu.pipeline_mode<synchronous>, transform_indices = @transform_3, window_bounds = array<i64: 128, 128>}, {pipeline_mode = #tpu.pipeline_mode<synchronous>, transform_indices = @transform_4, window_bounds = array<i64: 1, 128>}, {transform_indices = @transform_5, window_bounds = array<i64: 16, 128>}]} {
    %c0 = arith.constant 0 : index
    %c0_0 = arith.constant 0 : index
    %0 = vector.load %arg1[%c0, %c0_0] : memref<16x128xbf16, #tpu.memory_space<vmem>>, vector<16x128xbf16>
    %c0_1 = arith.constant 0 : index
    %c0_2 = arith.constant 0 : index
    %1 = vector.load %arg2[%c0_1, %c0_2] : memref<128x256xbf16, #tpu.memory_space<vmem>>, vector<128x256xbf16>
    %cst = arith.constant dense<0.000000e+00> : vector<16x256xf32>
    %2 = tpu.matmul %0, %1, %cst {dimension_numbers = #tpu.dot_dimension_numbers<[1], [0], [0], [1], [0, 0, 1, 1], [], []>} : vector<16x128xbf16>, vector<128x256xbf16>, vector<16x256xf32> -> vector<16x256xf32>
    %c0_3 = arith.constant 0 : index
    %c0_4 = arith.constant 0 : index
    %3 = vector.load %arg3[%c0_3, %c0_4] : memref<1x256xf32, #tpu.memory_space<vmem>>, vector<1x256xf32>
    %4 = vector.broadcast %3 : vector<1x256xf32> to vector<16x256xf32>
    %5 = arith.addf %2, %4 : vector<16x256xf32>
    %6 = vector.extract_strided_slice %5 {offsets = [0, 0], sizes = [16, 128], strides = [1, 1]} : vector<16x256xf32> to vector<16x128xf32>
    %7 = vector.extract_strided_slice %5 {offsets = [0, 128], sizes = [16, 128], strides = [1, 1]} : vector<16x256xf32> to vector<16x128xf32>
    %8 = arith.negf %6 : vector<16x128xf32>
    %9 = math.exp %8 : vector<16x128xf32>
    %cst_5 = arith.constant 1.000000e+00 : f32
    %10 = vector.broadcast %cst_5 : f32 to vector<16x128xf32>
    %11 = arith.addf %10, %9 : vector<16x128xf32>
    %12 = arith.divf %10, %11 : vector<16x128xf32>
    %13 = arith.mulf %6, %12 : vector<16x128xf32>
    %14 = arith.mulf %13, %7 : vector<16x128xf32>
    %15 = arith.truncf %14 : vector<16x128xf32> to vector<16x128xbf16>
    %c0_6 = arith.constant 0 : index
    %c0_7 = arith.constant 0 : index
    %16 = vector.load %arg4[%c0_6, %c0_7] : memref<128x128xbf16, #tpu.memory_space<vmem>>, vector<128x128xbf16>
    %cst_8 = arith.constant dense<0.000000e+00> : vector<16x128xf32>
    %17 = tpu.matmul %15, %16, %cst_8 {dimension_numbers = #tpu.dot_dimension_numbers<[1], [0], [0], [1], [0, 0, 1, 1], [], []>} : vector<16x128xbf16>, vector<128x128xbf16>, vector<16x128xf32> -> vector<16x128xf32>
    %c0_9 = arith.constant 0 : index
    %c0_10 = arith.constant 0 : index
    %18 = vector.load %arg5[%c0_9, %c0_10] : memref<1x128xf32, #tpu.memory_space<vmem>>, vector<1x128xf32>
    %19 = vector.broadcast %18 : vector<1x128xf32> to vector<16x128xf32>
    %20 = arith.addf %17, %19 : vector<16x128xf32>
    %c0_11 = arith.constant 0 : index
    %c0_12 = arith.constant 0 : index
    %21 = vector.load %arg6[%c0_11, %c0_12] : memref<16x128xf32, #tpu.memory_space<vmem>>, vector<16x128xf32>
    tpu.vector_store %arg6[%c0_11, %c0_12], %20 {strides = array<i32>} : memref<16x128xf32, #tpu.memory_space<vmem>>, vector<16x128xf32>,
    return
  }
  func.func @transform_0(%arg0: i32) -> (i32, i32) {
    %c0_i32 = arith.constant 0 : i32
    %c0_i32_0 = arith.constant 0 : i32
    return %arg0, %c0_i32 : i32, i32
  }
  func.func @transform_1(%arg0: i32) -> (i32, i32) {
    %c0_i32 = arith.constant 0 : i32
    %c0_i32_0 = arith.constant 0 : i32
    %c0_i32_1 = arith.constant 0 : i32
    return %c0_i32, %c0_i32_0 : i32, i32
  }
  func.func @transform_2(%arg0: i32) -> (i32, i32) {
    %c0_i32 = arith.constant 0 : i32
    %c0_i32_0 = arith.constant 0 : i32
    %c0_i32_1 = arith.constant 0 : i32
    return %c0_i32, %c0_i32_0 : i32, i32
  }
  func.func @transform_3(%arg0: i32) -> (i32, i32) {
    %c0_i32 = arith.constant 0 : i32
    %c0_i32_0 = arith.constant 0 : i32
    %c0_i32_1 = arith.constant 0 : i32
    return %c0_i32, %c0_i32_0 : i32, i32
  }
  func.func @transform_4(%arg0: i32) -> (i32, i32) {
    %c0_i32 = arith.constant 0 : i32
    %c0_i32_0 = arith.constant 0 : i32
    %c0_i32_1 = arith.constant 0 : i32
    return %c0_i32, %c0_i32_0 : i32, i32
  }
  func.func @transform_5(%arg0: i32) -> (i32, i32) {
    %c0_i32 = arith.constant 0 : i32
    %c0_i32_0 = arith.constant 0 : i32
    return %arg0, %c0_i32 : i32, i32
  }
}

</mosaic_0001>

<bundles_post_ra>
// kernel: tpu_custom_call.1
= control target key start
LH: loop header
LB: loop body
LE: loop exit
PB: predicated region body
PF: predicated region fallthrough
CT: control target
= control target key end

     0   :  { %10 = vsyncpa [#allocation3], 0  ;;  %s631_s0 = inlined_call_operand.hbm [shape: bf16[16,128], index: 0, kind: input, shape index: {}]   ;;  %s632_s1 = inlined_call_operand.hbm [shape: bf16[128,256], index: 1, kind: input, shape index: {}]   ;;  %s633_s2 = inlined_call_operand.vmem [shape: f32[1,256], index: 2, kind: input, shape index: {}]   ;;  %s634_s3 = inlined_call_operand.hbm [shape: bf16[128,128], index: 3, kind: input, shape index: {}]   ;;  %s635_s4 = inlined_call_operand.vmem [shape: f32[1,128], index: 4, kind: input, shape index: {}]   ;;  %s636_s5 = inlined_call_operand.hbm [shape: f32[16,128], index: 5, kind: output, shape index: {}]  }
   0x1   :  { %11 = vsyncpa [#allocation6], 0 }
   0x2   :  { %12 = vsyncpa [#allocation4], 0  ;;  %s566_s18 = smov [#allocation5]  }
   0x3   :  { %s30_s19 = sshll.u32 %s566_s18, 4  ;;  %s31_s19 = int_to_ptr.vmem [resolvable:$true] %s30_s19 }
   0x4   :  { %s488_s20 = scalar_lea.vmem %s31_s19, 2048  ;;  %p493_p1 = scmp.lt.s32.totalorder %s31_s19, %s31_s19 }
   0x5   :  { %p489_p0 = scmp.ne.s32.totalorder %s31_s19, %s488_s20  ;;  %p494_p2 = scmp.lt.s32.totalorder %s488_s20, %s488_s20 }
   0x7   :  { %p495_p3 = por %p494_p2, %p493_p1 }
   0x9   :  { %p496_p4 = pnand %p495_p3, %p489_p0 }
   0xb   :  { %499 = shalt.err (!%p496_p4)
}
   0xc   :  { %s567_s21 = smov 128   ;;  %s568_s22 = smov 8  }
   0xd   :  { %36 = dma.hbm_to_vmem [thread:$0]  %s632_s1, 2048, %s31_s19, [#allocation6], %s567_s21, %s567_s21, %s568_s22  }
   0xe   :  { %s569_s25 = smov [#allocation2]  }
   0xf   :  { %s18_s26 = sshll.u32 %s569_s25, 4  ;;  %s19_s26 = int_to_ptr.vmem [resolvable:$true] %s18_s26 }
  0x10   :  { %s508_s27 = scalar_lea.vmem %s19_s26, 128  ;;  %p513_p6 = scmp.lt.s32.totalorder %s19_s26, %s19_s26 }
  0x11   :  { %p509_p5 = scmp.ne.s32.totalorder %s19_s26, %s508_s27  ;;  %p514_p7 = scmp.lt.s32.totalorder %s508_s27, %s508_s27 }
  0x13   :  { %p515_p8 = por %p514_p7, %p513_p6 }
  0x15   :  { %p516_p9 = pnand %p515_p8, %p509_p5 }
  0x17   :  { %519 = shalt.err (!%p516_p9)
}
  0x18   :  { %s570_s28 = smov 64   ;;  %s571_s29 = smov 4  }
  0x19   :  { %24 = dma.hbm_to_vmem [thread:$0]  %s631_s0, 128, %s19_s26, [#allocation3], %s570_s28, %s570_s28, %s571_s29  }
  0x1a   :  { %s572_s7 = smov [#allocation7]  }
  0x1b   :  { %s44_s8 = sshll.u32 %s572_s7, 4  ;;  %s45_s8 = int_to_ptr.vmem [resolvable:$true] %s44_s8 }
  0x1c   :  { %s528_s1 = scalar_lea.vmem %s45_s8, 1024  ;;  %p533_p11 = scmp.lt.s32.totalorder %s45_s8, %s45_s8 }
  0x1d   :  { %p529_p10 = scmp.ne.s32.totalorder %s45_s8, %s528_s1  ;;  %p534_p12 = scmp.lt.s32.totalorder %s528_s1, %s528_s1 }
  0x1f   :  { %p535_p13 = por %p534_p12, %p533_p11 }
  0x21   :  { %p536_p0 = pnand %p535_p13, %p529_p10 }
  0x23   :  { %539 = shalt.err (!%p536_p0)
}
  0x24   :  { %50 = dma.hbm_to_vmem [thread:$0]  %s634_s3, 1024, %s45_s8, [#allocation6], %s570_s28, %s570_s28, %s571_s29  }
  0x25   :  { %560 = dma.done.wait [#allocation3], 128  }
  0x26   :  { %561 = vsyncadd [#allocation3], 4294967168 }
  0x27   :  { %562 = dma.done.wait [#allocation6], 3072  }
  0x28   :  { %563 = vsyncadd [#allocation6], 4294964224  ;;  %v573_v0 = vmov 0   ;;  %v439_v1 = vld [vmem:[#allocation5 + $0x74] ss:$8 sps:$4 sm:$0xff]   ;;  %v574_v19 = vmov 0.0   ;;  %v83_v27 = vlaneseq }
  0x29   :  { %211 = vmatprep.mubr.bf16.mxu0 %v573_v0  ;;  %v441_v2 = vld [vmem:[#allocation5 + $0x70] ss:$8 sps:$4 sm:$0xff]   ;;  %179 = vmatprep.subr.bf16.mxu0 %v439_v1  ;;  %v442_v3 = vld [vmem:[#allocation5 + $0x64] ss:$8 sps:$4 sm:$0xff]   ;;  %v444_v4 = vld [vmem:[#allocation5 + $0x60] ss:$8 sps:$4 sm:$0xff]  }
  0x2a   :  { %180 = vmatpush1.bf16.msra.mxu0 %v441_v2  ;;  %v445_v5 = vld [vmem:[#allocation5 + $0x54] ss:$8 sps:$4 sm:$0xff]   ;;  %v447_v6 = vld [vmem:[#allocation5 + $0x50] ss:$8 sps:$4 sm:$0xff]   ;;  %v448_v7 = vld [vmem:[#allocation5 + $0x44] ss:$8 sps:$4 sm:$0xff]   ;;  %408 = vmatprep.subr.bf16.mxu1 %v574_v19 }
  0x2b   :  { %181 = vmatprep.subr.bf16.mxu0 %v442_v3  ;;  %v450_v8 = vld [vmem:[#allocation5 + $0x40] ss:$8 sps:$4 sm:$0xff]   ;;  %v451_v9 = vld [vmem:[#allocation5 + $0x34] ss:$8 sps:$4 sm:$0xff]   ;;  %v453_v10 = vld [vmem:[#allocation5 + $0x30] ss:$8 sps:$4 sm:$0xff]  }
  0x2c   :  { %v454_v11 = vld [vmem:[#allocation5 + $0x24] ss:$8 sps:$4 sm:$0xff]   ;;  %v456_v12 = vld [vmem:[#allocation5 + $0x20] ss:$8 sps:$4 sm:$0xff]   ;;  %v457_v13 = vld [vmem:[#allocation5 + $0x14] ss:$8 sps:$4 sm:$0xff]  }
  0x2d   :  { %v459_v14 = vld [vmem:[#allocation5 + $0x10] ss:$8 sps:$4 sm:$0xff]   ;;  %v460_v15 = vld [vmem:[#allocation5 + $0x4] ss:$8 sps:$4 sm:$0xff]   ;;  %v462_v16 = vld [vmem:[#allocation5] ss:$8 sps:$4 sm:$0xff]  }
  0x2e   :  { %182 = vmatpush1.bf16.msra.mxu0 %v444_v4  ;;  %v463_v17 = vld [vmem:[#allocation2] sm:$0xff]   ;;  %v465_v20 = vld [vmem:[#allocation7 + $0x30] sm:$0xff]   ;;  %v466_v21 = vld [vmem:[#allocation7 + $0x28] sm:$0xff]   ;;  %vm575_vm0 = vmmov 0   ;;  %v84_v28 = vshrl.u32 %v83_v27, 7  ;;  %s576_s12 = smov [#allocation8]  }
  0x2f   :  { %183 = vmatprep.subr.bf16.mxu0 %v445_v5  ;;  %v464_v18 = vld [vmem:[#allocation7 + $0x38] sm:$0xff]   ;;  %v467_v22 = vld [vmem:[#allocation7 + $0x20] sm:$0xff]   ;;  %v469_v24 = vld [vmem:[#allocation7 + $0x10] sm:$0xff]   ;;  %424 = vmatprep.mubr.msk.bf16.mxu1 %vm575_vm0, %v574_v19  ;;  %s358_s13 = sshll.u32 %s576_s12, 4  ;;  %s359_s13 = int_to_ptr.vmem [resolvable:$true] %s358_s13 }
  0x30   :  { %409 = vmatpush3.bf16.msra.mxu1 %v464_v18  ;;  %v468_v23 = vld [vmem:[#allocation7 + $0x18] sm:$0xff]   ;;  %v470_v25 = vld [vmem:[#allocation7 + $0x8] sm:$0xff]   ;;  %v471_v26 = vld [vmem:[#allocation7] sm:$0xff]   ;;  %v85_v29 = vsub.s32 0, %v84_v28  ;;  %v89_v43 = vsub.s32 1, %v84_v28  ;;  %s540_s14 = scalar_lea.vmem %s359_s13, 256  ;;  %p545_p2 = scmp.lt.s32.totalorder %s359_s13, %s359_s13 }
  0x31   :  { %410 = vmatprep.subr.bf16.mxu1 %v574_v19  ;;  %v81_v30 = vld [vmem:[%s633_s2] sm:$0x3]  ;;  %p541_p1 = scmp.ne.s32.totalorder %s359_s13, %s540_s14  ;;  %p546_p3 = scmp.lt.s32.totalorder %s540_s14, %s540_s14 }
  0x32   :  { %184 = vmatpush1.bf16.msra.mxu0 %v447_v6  ;;  %v86_v31 = vrot.slane %v81_v30, %v85_v29  ;;  %v90_v45 = vrot.slane %v81_v30, %v89_v43  ;;  %v390_v55 = vld [vmem:[%s635_s4] ss:$0 sm:$0xff] }
  0x33   :  { %185 = vmatprep.subr.bf16.mxu0 %v448_v7  ;;  %p547_p4 = por %p546_p3, %p545_p2 }
  0x34   :  { %411 = vmatpush3.bf16.msra.mxu1 %v465_v20 }
  0x35   :  { %412 = vmatprep.subr.bf16.mxu1 %v574_v19  ;;  %p548_p5 = pnand %p547_p4, %p541_p1 }
  0x36   :  { %186 = vmatpush1.bf16.msra.mxu0 %v450_v8 }
  0x37   :  { %187 = vmatprep.subr.bf16.mxu0 %v451_v9 }
  0x38   :  { %413 = vmatpush3.bf16.msra.mxu1 %v466_v21 }
  0x39   :  { %414 = vmatprep.subr.bf16.mxu1 %v574_v19 }
  0x3a   :  { %188 = vmatpush1.bf16.msra.mxu0 %v453_v10 }
  0x3b   :  { %189 = vmatprep.subr.bf16.mxu0 %v454_v11 }
  0x3c   :  { %415 = vmatpush3.bf16.msra.mxu1 %v467_v22 }
  0x3d   :  { %416 = vmatprep.subr.bf16.mxu1 %v574_v19 }
  0x3e   :  { %190 = vmatpush1.bf16.msra.mxu0 %v456_v12 }
  0x3f   :  { %191 = vmatprep.subr.bf16.mxu0 %v457_v13 }
  0x40   :  { %417 = vmatpush3.bf16.msra.mxu1 %v468_v23 }
  0x41   :  { %418 = vmatprep.subr.bf16.mxu1 %v574_v19 }
  0x42   :  { %192 = vmatpush1.bf16.msra.mxu0 %v459_v14 }
  0x43   :  { %193 = vmatprep.subr.bf16.mxu0 %v460_v15 }
  0x44   :  { %419 = vmatpush3.bf16.msra.mxu1 %v469_v24 }
  0x45   :  { %420 = vmatprep.subr.bf16.mxu1 %v574_v19 }
  0x46   :  { %194 = vmatpush1.bf16.msra.mxu0 %v462_v16 }
  0x48   :  { %421 = vmatpush3.bf16.msra.mxu1 %v470_v25 }
  0x49   :  { %212 = vmatmul.mubr.bf16.vlgmr.msra.gmra.mxu0 %v463_v17  ;;  %422 = vmatprep.subr.bf16.mxu1 %v574_v19 }
  0x4c   :  { %423 = vmatpush3.bf16.msra.mxu1 %v471_v26 }
 0x109   :  { %v213_v32 = vpop.f32.mrf.mxu0 }
 0x10a   :  { %v214_v33 = vadd.f32 %v213_v32, %v86_v31 }
 0x10b   :  { %v215_v34 = vpop.f32.mrf.mxu0 }
 0x10c   :  { %v388_v35 = vmul.f32 -1.442695, %v214_v33  ;;  %v216_v49 = vadd.f32 %v215_v34, %v90_v45 }
 0x10d   :  { %v217_v36 = vpop.f32.mrf.mxu0 }
 0x10e   :  { %472 = vpow2.f32 %v388_v35  ;;  %v218_v37 = vadd.f32 %v217_v36, %v86_v31 }
 0x10f   :  { %v219_v46 = vpop.f32.mrf.mxu0 }
 0x110   :  { %v389_v38 = vmul.f32 -1.442695, %v218_v37  ;;  %v220_v51 = vadd.f32 %v219_v46, %v90_v45 }
 0x112   :  { %474 = vpow2.f32 %v389_v38 }
 0x11b   :  { %v473_v39 = vpop.eup %472 }
 0x11c   :  { %v228_v40 = vadd.f32 1.0, %v473_v39 }
 0x11e   :  { %476 = vrcp.f32 %v228_v40 }
 0x11f   :  { %v475_v41 = vpop.eup %474 }
 0x120   :  { %v229_v42 = vadd.f32 1.0, %v475_v41 }
 0x122   :  { %478 = vrcp.f32 %v229_v42 }
 0x12b   :  { %v477_v44 = vpop.eup %476 }
 0x12c   :  { %v234_v47 = vmul.f32 %v477_v44, %v214_v33 }
 0x12e   :  { %v236_v52 = vmul.f32 %v234_v47, %v216_v49 }
 0x12f   :  { %v479_v48 = vpop.eup %478 }
 0x130   :  { %v235_v50 = vmul.f32 %v479_v48, %v218_v37 }
 0x132   :  { %v237_v53 = vmul.f32 %v235_v50, %v220_v51 }
 0x134   :  { %v238_v54 = vpack.c.bf16 %v237_v53, %v236_v52 }
 0x136   :  { %425 = vmatmul.mubr.bf16.vlgmr.msra.gmra.mxu1 %v238_v54 }
 0x1f6   :  { %v344_v56 = vpop.f32.mrf.mxu1 }
 0x1f7   :  { %v345_v57 = vadd.f32 %v390_v55, %v344_v56 }
 0x1f8   :  { %v426_v58 = vpop.f32.mrf.mxu1 }
 0x1f9   :  { %351 = vst [vmem:[#allocation8] sm:$0xff] %v345_v57 }
 0x1fa   :  { %v347_v59 = vpop.f32.mrf.mxu1 }
 0x1fb   :  { %v348_v60 = vadd.f32 %v390_v55, %v347_v59 }
 0x1fc   :  { %v427_v61 = vpop.f32.mrf.mxu1 }
 0x1fd   :  { %352 = vst [vmem:[#allocation8 + $0x8] sm:$0xff] %v348_v60 }
 0x1fe   :  { %551 = shalt.err (!%p548_p5)
}
 0x1ff   :  { %364 = dma.vmem_to_hbm [thread:$0]  %s359_s13, 256, %s636_s5, [#allocation4], %s567_s21, %s567_s21, %s568_s22  }
 0x200   :  { %564 = dma.done.wait [#allocation4], 256  }
 0x201   :  { %565 = vsyncadd [#allocation4], 4294967040 }
 0x202   :  { %368 = vsyncpa [#allocation3], 1 }
 0x203   :  { %369 = vsyncpa [#allocation6], 1 }
 0x204   :  { %370 = vsyncpa [#allocation4], 1 }

</bundles_post_ra>
